<compile_context>
chip_gen: v7x
topology: tpu7x:2x2x1
jax: 0.10.0
libtpu: 0.0.40
codegen_flags: <defaults>
</compile_context>

<pallas_src>
import jax
import jax.numpy as jnp
from jax import lax
from jax.experimental import pallas as pl
from jax.experimental.pallas import tpu as pltpu


def _cdiv(a: int, b: int) -> int:
    return (a + b - 1) // b


def _round_up(n: int, m: int) -> int:
    return _cdiv(n, m) * m


def _logreg_kernel(x_ref, w_ref, b_ref, o_ref, acc_ref):
    # x_ref  : (TB, TD) VMEM  -- streamed batch x feature tile
    # w_ref  : (1,  TD) VMEM  -- weight tile (same block for every batch tile)
    # b_ref  : (1,)     SMEM  -- bias scalar
    # o_ref  : (1,  TB) VMEM  -- lane-dense output tile (written on last D step)
    # acc_ref: (1,  TB) f32 VMEM scratch accumulator
    k = pl.program_id(1)

    @pl.when(k == 0)
    def _():
        acc_ref[...] = jnp.zeros_like(acc_ref)

    # Contract over D with x as RHS: result is already lane-dense (1, TB), so no
    # per-tile transpose/relayout of the (TB, TD) x tile is needed.
    acc_ref[...] += lax.dot_general(
        w_ref[...], x_ref[...],
        dimension_numbers=(((1,), (1,)), ((), ())),
        preferred_element_type=jnp.float32,
    )

    @pl.when(k == pl.num_programs(1) - 1)
    def _():
        o_ref[...] = jax.nn.sigmoid(acc_ref[...] + b_ref[0]).astype(o_ref.dtype)


def _choose_tiles(B: int, D: int, target_bytes: int):
    """Pick (TB, TD): ~target_bytes of f32 x per pipeline buffer, 128-aligned."""
    # --- contraction (D) tile: must divide D exactly (no garbage accumulation) ---
    max_td = max(128, ((target_bytes // (4 * 128)) // 128) * 128)
    if D % 128 == 0 and D > max_td:
        td = 128
        for m in range(max_td // 128, 0, -1):
            if D % (128 * m) == 0:
                td = 128 * m
                break
    else:
        td = D  # full feature dim in one block
    # --- batch tile: multiple of 128 rows targeting ~target_bytes per buffer ---
    tb = max(128, ((target_bytes // (4 * td)) // 128) * 128)
    if B > 256 and _cdiv(B, tb) < 2:
        # Keep at least 2 batch tiles so v7x's two TensorCores both get work.
        tb = _round_up(_cdiv(B, 2), 128)
    if tb >= B:
        tb = B  # single exact full-dim tile (valid for any B, no ragged block)
    return tb, td


def logistic_regression_forward(x, weight, bias, *, target_tile_bytes=4 * 1024 * 1024):
    """y_pred = sigmoid(x @ weight.T + bias)

    x:      (B, D) float32
    weight: (1, D) float32   (PyTorch nn.Linear weight layout)
    bias:   (1,)   float32
    returns (B, 1) float32
    """
    B, D = x.shape
    x_in = x.astype(jnp.float32)
    w_in = weight.reshape(1, D).astype(jnp.float32)
    b_in = bias.reshape(1).astype(jnp.float32)

    # Rare fallback only: a huge, non-128-aligned D cannot be tiled exactly along
    # the reduction axis, so zero-pad the feature dim (zero columns contribute
    # nothing to the dot).  Typical shapes take the copy-free path.
    D_eff = D
    if D % 128 != 0 and 128 * D * 4 > 4 * target_tile_bytes:
        D_eff = _round_up(D, 128)
        x_in = jnp.pad(x_in, ((0, 0), (0, D_eff - D)))
        w_in = jnp.pad(w_in, ((0, 0), (0, D_eff - D)))

    TB, TD = _choose_tiles(B, D_eff, target_tile_bytes)
    nb = _cdiv(B, TB)      # ragged last batch tile handled by Pallas
    nd = D_eff // TD       # TD divides D_eff exactly

    # Explicit scoped-VMEM budget with headroom (v5e default 16 MiB, v6e/v7x 32 MiB):
    # x double-buffer dominates; everything else is tiny.
    vmem_need = 4 * (2 * TB * TD + 2 * TD + 2 * TB + TB)
    vmem_limit = int(min(48 * 1024 * 1024, max(2 * vmem_need, 16 * 1024 * 1024)))

    out = pl.pallas_call(
        _logreg_kernel,
        out_shape=jax.ShapeDtypeStruct((1, B), jnp.float32),
        grid=(nb, nd),
        in_specs=[
            pl.BlockSpec((TB, TD), lambda i, k: (i, k)),            # x: streamed tiles
            pl.BlockSpec((1, TD), lambda i, k: (0, k)),             # weight: D tiles only
            pl.BlockSpec(memory_space=pltpu.MemorySpace.SMEM),      # bias: scalar in SMEM
        ],
        out_specs=pl.BlockSpec((1, TB), lambda i, k: (0, i)),        # lane-dense output
        scratch_shapes=[pltpu.VMEM((1, TB), jnp.float32)],           # accumulator
        compiler_params=pltpu.CompilerParams(
            dimension_semantics=("parallel", "arbitrary"),           # batch || , D reduce
            vmem_limit_bytes=vmem_limit,
        ),
        cost_estimate=pl.CostEstimate(
            flops=2 * B * D,
            transcendentals=B,
            bytes_accessed=4 * (B * D + D + B),
        ),
    )(x_in, w_in, b_in)

    # (1, B) -> (B, 1): wrapper-side layout plumbing only.
    return out[0].reshape(B, 1)


if __name__ == "__main__":
    # Small, deterministic setup consistent with nn.Linear(input_dim, 1)
    batch = 8
    input_dim = 32

    key = jax.random.PRNGKey(0)
    kx, kw, kb = jax.random.split(key, 3)

    x = jax.random.normal(kx, (batch, input_dim), dtype=jnp.float32)
    bound = 1.0 / (input_dim ** 0.5)
    weight = jax.random.uniform(kw, (1, input_dim), jnp.float32, -bound, bound)
    bias = jax.random.uniform(kb, (1,), jnp.float32, -bound, bound)

    y_pred = logistic_regression_forward(x, weight, bias)
    jax.block_until_ready(y_pred)
    ref = jax.nn.sigmoid(x @ weight.T + bias)
    assert y_pred.shape == (batch, 1)
    assert jnp.allclose(y_pred, ref, atol=1e-6), "mismatch vs reference (small case)"

    # Also exercise the tiled / ragged-last-batch-tile path (B not a multiple of 128).
    B2, D2 = 300, 160
    x2 = jax.random.normal(kx, (B2, D2), dtype=jnp.float32)
    w2 = jax.random.uniform(kw, (1, D2), jnp.float32, -0.1, 0.1)
    b2 = jax.random.uniform(kb, (1,), jnp.float32, -0.1, 0.1)
    y2 = logistic_regression_forward(x2, w2, b2)
    jax.block_until_ready(y2)
    ref2 = jax.nn.sigmoid(x2 @ w2.T + b2)
    assert y2.shape == (B2, 1)
    assert jnp.allclose(y2, ref2, atol=1e-5), "mismatch vs reference (ragged case)"

    print("KERNEL_OK")
</pallas_src>

<mosaic_0001>
module attributes {stable_mosaic.version = 11 : i64} {
  func.func @_logreg_kernel(%arg0: i32, %arg1: i32, %arg2: memref<8x32xf32, #tpu.memory_space<vmem>>, %arg3: memref<1x32xf32, #tpu.memory_space<vmem>>, %arg4: memref<1xf32, #tpu.memory_space<smem>>, %arg5: memref<1x8xf32, #tpu.memory_space<vmem>>, %arg6: memref<1x8xf32, #tpu.memory_space<vmem>>) attributes {dimension_semantics = [#tpu.dimension_semantics<parallel>, #tpu.dimension_semantics<arbitrary>], iteration_bounds = array<i64: 1, 1>, scalar_prefetch = 0 : i64, scratch_operands = 1 : i64, tpu.core_type = #tpu.core_type<tc>, window_params = [{transform_indices = @transform_0, window_bounds = array<i64: 8, 32>}, {transform_indices = @transform_1, window_bounds = array<i64: 1, 32>}, {transform_indices = @transform_2, window_bounds = array<i64: 1>}, {transform_indices = @transform_3, window_bounds = array<i64: 1, 8>}]} {
    %c0_i32 = arith.constant 0 : i32
    %0 = arith.cmpi eq, %arg1, %c0_i32 : i32
    %1 = arith.extui %0 : i1 to i32
    %c0_i32_0 = arith.constant 0 : i32
    %2 = arith.cmpi ne, %1, %c0_i32_0 : i32
    scf.if %2 {
      %cst_10 = arith.constant 0.000000e+00 : f32
      %12 = vector.broadcast %cst_10 : f32 to vector<1x8xf32>
      %c0_11 = arith.constant 0 : index
      %c0_12 = arith.constant 0 : index
      %13 = vector.load %arg6[%c0_11, %c0_12] : memref<1x8xf32, #tpu.memory_space<vmem>>, vector<1x8xf32>
      tpu.vector_store %arg6[%c0_11, %c0_12], %12 {strides = array<i32>} : memref<1x8xf32, #tpu.memory_space<vmem>>, vector<1x8xf32>,
    } else {
    }
    %c0 = arith.constant 0 : index
    %c0_1 = arith.constant 0 : index
    %3 = vector.load %arg6[%c0, %c0_1] : memref<1x8xf32, #tpu.memory_space<vmem>>, vector<1x8xf32>
    %c0_2 = arith.constant 0 : index
    %c0_3 = arith.constant 0 : index
    %4 = vector.load %arg3[%c0_2, %c0_3] : memref<1x32xf32, #tpu.memory_space<vmem>>, vector<1x32xf32>
    %c0_4 = arith.constant 0 : index
    %c0_5 = arith.constant 0 : index
    %5 = vector.load %arg2[%c0_4, %c0_5] : memref<8x32xf32, #tpu.memory_space<vmem>>, vector<8x32xf32>
    %cst = arith.constant dense<0.000000e+00> : vector<1x8xf32>
    %6 = tpu.matmul %4, %5, %cst {dimension_numbers = #tpu.dot_dimension_numbers<[1], [1], [0], [0], [0, 0, 1, 0], [], []>} : vector<1x32xf32>, vector<8x32xf32>, vector<1x8xf32> -> vector<1x8xf32>
    %7 = arith.addf %3, %6 : vector<1x8xf32>
    %c0_6 = arith.constant 0 : index
    %c0_7 = arith.constant 0 : index
    %8 = vector.load %arg6[%c0_6, %c0_7] : memref<1x8xf32, #tpu.memory_space<vmem>>, vector<1x8xf32>
    tpu.vector_store %arg6[%c0_6, %c0_7], %7 {strides = array<i32>} : memref<1x8xf32, #tpu.memory_space<vmem>>, vector<1x8xf32>,
    %c0_i32_8 = arith.constant 0 : i32
    %9 = arith.cmpi eq, %arg1, %c0_i32_8 : i32
    %10 = arith.extui %9 : i1 to i32
    %c0_i32_9 = arith.constant 0 : i32
    %11 = arith.cmpi ne, %10, %c0_i32_9 : i32
    scf.if %11 {
      %c0_10 = arith.constant 0 : index
      %c0_11 = arith.constant 0 : index
      %12 = vector.load %arg6[%c0_10, %c0_11] : memref<1x8xf32, #tpu.memory_space<vmem>>, vector<1x8xf32>
      %c0_12 = arith.constant 0 : index
      %13 = memref.load %arg4[%c0_12] : memref<1xf32, #tpu.memory_space<smem>>
      %14 = vector.broadcast %13 : f32 to vector<1x8xf32>
      %15 = arith.addf %12, %14 : vector<1x8xf32>
      %16 = arith.negf %15 : vector<1x8xf32>
      %17 = math.exp %16 : vector<1x8xf32>
      %cst_13 = arith.constant 1.000000e+00 : f32
      %18 = vector.broadcast %cst_13 : f32 to vector<1x8xf32>
      %19 = arith.addf %18, %17 : vector<1x8xf32>
      %20 = arith.divf %18, %19 : vector<1x8xf32>
      %c0_14 = arith.constant 0 : index
      %c0_15 = arith.constant 0 : index
      %21 = vector.load %arg5[%c0_14, %c0_15] : memref<1x8xf32, #tpu.memory_space<vmem>>, vector<1x8xf32>
      tpu.vector_store %arg5[%c0_14, %c0_15], %20 {strides = array<i32>} : memref<1x8xf32, #tpu.memory_space<vmem>>, vector<1x8xf32>,
    } else {
    }
    return
  }
  func.func @transform_0(%arg0: i32, %arg1: i32) -> (i32, i32) {
    %c0_i32 = arith.constant 0 : i32
    return %arg0, %arg1 : i32, i32
  }
  func.func @transform_1(%arg0: i32, %arg1: i32) -> (i32, i32) {
    %c0_i32 = arith.constant 0 : i32
    %c0_i32_0 = arith.constant 0 : i32
    return %c0_i32, %arg1 : i32, i32
  }
  func.func @transform_2(%arg0: i32, %arg1: i32) -> i32 {
    %c0_i32 = arith.constant 0 : i32
    %c0_i32_0 = arith.constant 0 : i32
    return %c0_i32 : i32
  }
  func.func @transform_3(%arg0: i32, %arg1: i32) -> (i32, i32) {
    %c0_i32 = arith.constant 0 : i32
    %c0_i32_0 = arith.constant 0 : i32
    return %c0_i32, %arg0 : i32, i32
  }
}

</mosaic_0001>

<bundles_post_ra>
// kernel: tpu_custom_call.1
= control target key start
LH: loop header
LB: loop body
LE: loop exit
PB: predicated region body
PF: predicated region fallthrough
CT: control target
= control target key end

     0   :  { %9 = vsyncpa [#allocation5], 0  ;;  %s269_s0 = inlined_call_operand.hbm [shape: f32[8,32], index: 0, kind: input, shape index: {}]   ;;  %s270_s1 = inlined_call_operand.vmem [shape: f32[1,32], index: 1, kind: input, shape index: {}]   ;;  %s271_s2 = inlined_call_operand.<no memory space> [shape: f32[1], index: 2, kind: input, shape index: {}]   ;;  %s272_s3 = inlined_call_operand.hbm [shape: f32[1,8], index: 3, kind: output, shape index: {}]  }
   0x1   :  { %10 = vsyncpa [#allocation6], 0  ;;  %s212_s12 = smov [#allocation4]   ;;  %s164_s16 = scalar_lea.hbm %s269_s0, 128 }
   0x2   :  { %s17_s13 = sshll.u32 %s212_s12, 4  ;;  %p165_p0 = scmp.ne.s32.totalorder %s269_s0, %s164_s16  ;;  %s18_s13 = int_to_ptr.vmem [resolvable:$true] %s17_s13 }
   0x3   :  { %p168_p1 = scmp.lt.u32.totalorder %s164_s16, %s269_s0 }
   0x5   :  { %p170_p2 = pnand %p168_p1, %p165_p0 }
   0x7   :  { %173 = shalt.err (!%p170_p2)
}
   0x8   :  { %s174_s21 = scalar_lea.vmem %s18_s13, 128  ;;  %p179_p4 = scmp.lt.s32.totalorder %s18_s13, %s18_s13 }
   0x9   :  { %p175_p3 = scmp.ne.s32.totalorder %s18_s13, %s174_s21  ;;  %p180_p5 = scmp.lt.s32.totalorder %s174_s21, %s174_s21 }
   0xb   :  { %p181_p6 = por %p180_p5, %p179_p4 }
   0xd   :  { %p182_p7 = pnand %p181_p6, %p175_p3 }
   0xf   :  { %185 = shalt.err (!%p182_p7)
}
  0x10   :  { %20 = dma.hbm_to_vmem [thread:$0]  %s269_s0, 128, %s18_s13, [#allocation5]  }
  0x11   :  { %208 = dma.done.wait [#allocation5], 128  }
  0x12   :  { %209 = vsyncadd [#allocation5], 4294967168  ;;  %vm32_vm0 = vcmask 57344   ;;  %v213_v0 = vmov 0.0   ;;  %vm214_vm1 = vmmov 0   ;;  %vm37_vm2 = vcmask 261120  }
  0x13   :  { %33 = vst.msk [vmem:[#allocation2] sm:$0x1] %vm32_vm0, %v213_v0  ;;  %151 = vmatprep.subr.mxu0 %v213_v0  ;;  %153 = vmatprep.mubr.msk.f32.mxu0 %vm214_vm1, %v213_v0  ;;  %v36_v1 = vld [vmem:[#allocation4] sm:$0xff]  ;;  %v35_v2 = vld [vmem:[%s270_s1] sm:$0x1]  ;;  %v122_v7 = vstv %s271_s2  ;;  %s215_s27 = smov [#allocation7]  }
  0x14   :  { %152 = vmatpush3.xpose.msk.msra.mxu0 %vm37_vm2, %v36_v1  ;;  %s137_s1 = sshll.u32 %s215_s27, 4  ;;  %s138_s1 = int_to_ptr.vmem [resolvable:$true] %s137_s1 }
  0x15   :  { %s186_s28 = scalar_lea.vmem %s138_s1, 16  ;;  %s190_s29 = scalar_lea.vmem %s138_s1, 32 }
  0x16   :  { %p187_p8 = scmp.ne.s32.totalorder %s138_s1, %s186_s28  ;;  %p191_p9 = scmp.lt.s32.totalorder %s138_s1, %s138_s1 }
  0x17   :  { %154 = vmatmul.mubr.msk.f32.vlgmr.msra.gmra.mrb[0].mxu0 %vm37_vm2, %v35_v2  ;;  %p192_p10 = scmp.lt.s32.totalorder %s190_s29, %s186_s28 }
  0x19   :  { %p193_p11 = por %p192_p10, %p191_p9 }
  0x1a   :  { %v34_v3 = vld [vmem:[#allocation2] sm:$0x1] }
  0x1b   :  { %p194_p12 = pnand %p193_p11, %p187_p8 }
  0xea   :  { %v110_v4 = vpop.f32.mrb[0].mxu0 }
  0xeb   :  { %v114_v5 = vadd.f32 %v110_v4, %v34_v3  ;;  %v155_v6 = vpop.f32.mrb[1].mxu0 }
  0xed   :  { %116 = vst.msk [vmem:[#allocation2] sm:$0x1] %vm32_vm0, %v114_v5 }
  0xf4   :  { %v120_v8 = vld [vmem:[#allocation2] sm:$0x1] }
  0xf5   :  { %v123_v9 = vadd.f32 %v122_v7, %v120_v8 }
  0xf7   :  { %v148_v10 = vmul.f32 -1.442695, %v123_v9 }
  0xf9   :  { %160 = vpow2.f32 %v148_v10 }
 0x103   :  { %v161_v11 = vpop.eup %160 }
 0x104   :  { %v127_v12 = vadd.f32 1.0, %v161_v11 }
 0x106   :  { %162 = vrcp.f32 %v127_v12 }
 0x110   :  { %v163_v13 = vpop.eup %162 }
 0x111   :  { %130 = vst.msk [vmem:[#allocation7] sm:$0x1] %vm32_vm0, %v163_v13 }
 0x112   :  { %197 = shalt.err (!%p194_p12)
}
 0x113   :  { %s198_s4 = scalar_lea.hbm %s272_s3, 16 }
 0x114   :  { %p199_p13 = scmp.ne.s32.totalorder %s272_s3, %s198_s4  ;;  %p202_p0 = scmp.lt.u32.totalorder %s198_s4, %s272_s3 }
 0x116   :  { %p204_p1 = pnand %p202_p0, %p199_p13 }
 0x118   :  { %207 = shalt.err (!%p204_p1)
}
 0x119   :  { %140 = dma.vmem_to_hbm [thread:$0]  %s138_s1, 16, %s272_s3, [#allocation6]  }
 0x11a   :  { %210 = dma.done.wait [#allocation6], 16  }
 0x11b   :  { %211 = vsyncadd [#allocation6], 4294967280 }
 0x11c   :  { %144 = vsyncpa [#allocation5], 1 }
 0x11d   :  { %145 = vsyncpa [#allocation6], 1 }

</bundles_post_ra>
